<compile_context>
chip_gen: v7x
topology: tpu7x:2x2x1
jax: 0.10.0
libtpu: 0.0.40
codegen_flags: <defaults>
</compile_context>

<pallas_src>
import functools

import jax
import jax.numpy as jnp
from jax import lax
from jax.experimental import pallas as pl
from jax.experimental.pallas import tpu as pltpu


def _self_attn_kernel(xq_ref, xf_ref, wq_ref, bq_ref, wk_ref, bk_ref,
                      wv_ref, bv_ref, gamma_ref, out_ref, *rest, emit_attn):
    """One (batch, query-tile) grid step.

    xq_ref  : (1, C, TQ)  query tile of the input (channels-first)
    xf_ref  : (1, C, N)   full input for this batch element (K/V source)
    wq/wk   : (Cq, C)     1x1 conv weights (out, in), compute dtype
    wv      : (C, C)
    bq/bk   : (Cq, 1)     f32 biases (broadcast over positions)
    bv      : (C, 1)
    gamma   : (1,)        SMEM scalar residual scale
    out_ref : (1, C, TQ)  gamma * attn(V) + x
    attn_ref: (1, TQ, N)  (only when emit_attn)
    k_scr   : (Cq, N) f32 VMEM scratch, v_scr: (C, N) compute-dtype scratch
    """
    if emit_attn:
        attn_ref, k_scr, v_scr = rest
    else:
        attn_ref = None
        k_scr, v_scr = rest

    qt = pl.program_id(1)
    cdt = v_scr.dtype  # compute dtype fed to the MXU (bf16 by default)

    # K / V projections over the full sequence, computed once per batch element
    # (qt is the innermost, sequentially iterated "arbitrary" grid axis).
    @pl.when(qt == 0)
    def _():
        xf = xf_ref[0].astype(cdt)                                            # (C, N)
        k = jnp.dot(wk_ref[...], xf, preferred_element_type=jnp.float32) + bk_ref[...]
        v = jnp.dot(wv_ref[...], xf, preferred_element_type=jnp.float32) + bv_ref[...]
        k_scr[...] = k.astype(k_scr.dtype)
        v_scr[...] = v.astype(v_scr.dtype)

    x_q = xq_ref[0]                                                           # (C, TQ) f32
    q = jnp.dot(wq_ref[...], x_q.astype(cdt),
                preferred_element_type=jnp.float32) + bq_ref[...]             # (Cq, TQ)

    # energy[n, m] = sum_d q[d, n] * k[d, m]; contract the channel dim of both
    # operands directly (no materialized transpose before the MXU).
    energy = lax.dot_general(
        q, k_scr[...],
        dimension_numbers=(((0,), (0,)), ((), ())),
        preferred_element_type=jnp.float32)                                   # (TQ, N)

    # Numerically-stable softmax over key positions (rows), f32 math.
    e_max = jnp.max(energy, axis=-1, keepdims=True)
    p = jnp.exp(energy - e_max)
    denom = jnp.sum(p, axis=-1, keepdims=True)
    attn = p * pl.reciprocal(denom, approx=True)                              # (TQ, N)

    # out[c, n] = sum_m v[c, m] * attn[n, m]   (== torch bmm(V, attn^T))
    attn_v = lax.dot_general(
        v_scr[...], attn.astype(cdt),
        dimension_numbers=(((1,), (1,)), ((), ())),
        preferred_element_type=jnp.float32)                                   # (C, TQ)

    gamma = gamma_ref[0]
    out_ref[0] = (gamma * attn_v + x_q.astype(jnp.float32)).astype(out_ref.dtype)
    if emit_attn:
        attn_ref[0] = attn.astype(attn_ref.dtype)


def _pick_tq(n):
    """Query-tile size: full N if small, else the largest 128-multiple divisor."""
    if n <= 512:
        return n
    for cand in (512, 384, 256, 128):
        if n % cand == 0:
            return cand
    return n  # fallback: monolithic (rare; N not a multiple of 128)


def self_attn_forward(x_nchw, params, *, with_attention=False,
                      compute_dtype=jnp.bfloat16, tq=None):
    """Pallas implementation of Self_Attn.forward.

    x_nchw : (B, C, H, W), matching the PyTorch NCHW convention.
    params : wq/wk (Cq, C), wv (C, C), bq/bk (Cq,), bv (C,), gamma (1,).
    """
    B, C, H, W = x_nchw.shape
    N = H * W
    Cq = max(C // 8, 1)

    if tq is None:
        tq = _pick_tq(N)
    assert N % tq == 0
    nqt = N // tq

    # Weight prep: weights in compute dtype for the MXU, biases/gamma in f32.
    wq = params["wq"].astype(compute_dtype)
    wk = params["wk"].astype(compute_dtype)
    wv = params["wv"].astype(compute_dtype)
    bq = params["bq"].reshape(Cq, 1).astype(jnp.float32)
    bk = params["bk"].reshape(Cq, 1).astype(jnp.float32)
    bv = params["bv"].reshape(C, 1).astype(jnp.float32)
    gamma = params["gamma"].reshape(1).astype(jnp.float32)

    # NCHW -> (B, C, N): a free reshape (no transpose passes over HBM).
    x_cn = x_nchw.reshape(B, C, N)

    grid = (B, nqt)

    in_specs = [
        pl.BlockSpec((1, C, tq), lambda b, qt: (b, 0, qt)),   # x query tile
        pl.BlockSpec((1, C, N), lambda b, qt: (b, 0, 0)),     # full x (K/V source)
        pl.BlockSpec((Cq, C), lambda b, qt: (0, 0)),          # wq
        pl.BlockSpec((Cq, 1), lambda b, qt: (0, 0)),          # bq
        pl.BlockSpec((Cq, C), lambda b, qt: (0, 0)),          # wk
        pl.BlockSpec((Cq, 1), lambda b, qt: (0, 0)),          # bk
        pl.BlockSpec((C, C), lambda b, qt: (0, 0)),           # wv
        pl.BlockSpec((C, 1), lambda b, qt: (0, 0)),           # bv
        pl.BlockSpec(memory_space=pltpu.MemorySpace.SMEM),    # gamma scalar
    ]

    out_main_spec = pl.BlockSpec((1, C, tq), lambda b, qt: (b, 0, qt))
    if with_attention:
        out_shape = (jax.ShapeDtypeStruct((B, C, N), x_nchw.dtype),
                     jax.ShapeDtypeStruct((B, N, N), jnp.float32))
        out_specs = (out_main_spec,
                     pl.BlockSpec((1, tq, N), lambda b, qt: (b, qt, 0)))
    else:
        out_shape = jax.ShapeDtypeStruct((B, C, N), x_nchw.dtype)
        out_specs = out_main_spec

    scratch_shapes = [
        pltpu.VMEM((Cq, N), jnp.float32),      # K (f32: tiny, keeps energy exact-ish)
        pltpu.VMEM((C, N), compute_dtype),     # V (compute dtype for MXU)
    ]

    # VMEM budget estimate: double-buffered blocks + scratch, with headroom.
    in_bpe = jnp.dtype(x_nchw.dtype).itemsize
    cp_bpe = jnp.dtype(compute_dtype).itemsize
    est = 2 * (C * tq * in_bpe + C * N * in_bpe + C * tq * in_bpe)
    if with_attention:
        est += 2 * tq * N * 4
    est += Cq * N * 4 + C * N * cp_bpe
    est += 2 * ((2 * Cq * C + C * C) * cp_bpe + (2 * Cq + C) * 4)
    vmem_limit = int(min(max(2 * est + (8 << 20), 32 << 20), 64 << 20))

    kernel = functools.partial(_self_attn_kernel, emit_attn=with_attention)

    result = pl.pallas_call(
        kernel,
        out_shape=out_shape,
        grid_spec=pltpu.PrefetchScalarGridSpec(
            num_scalar_prefetch=0,
            grid=grid,
            in_specs=in_specs,
            out_specs=out_specs,
            scratch_shapes=scratch_shapes),
        compiler_params=pltpu.CompilerParams(
            dimension_semantics=("parallel", "arbitrary"),
            vmem_limit_bytes=vmem_limit),
    )(x_cn, x_cn, wq, bq, wk, bk, wv, bv, gamma)

    if with_attention:
        out_cn, attn = result
        return out_cn.reshape(B, C, H, W), attn
    return result.reshape(B, C, H, W)


def init_params(key, C):
    """Synthetic init matching the module's parameter shapes.

    PyTorch conv weights (out, in, 1, 1) are stored here as (out, in) matrices.
    gamma is initialized to 0.0, exactly as in the module.
    """
    Cq = max(C // 8, 1)
    k1, k2, k3, k4, k5, k6 = jax.random.split(key, 6)
    scale = 0.1
    return {
        "wq": scale * jax.random.normal(k1, (Cq, C), jnp.float32),
        "bq": scale * jax.random.normal(k2, (Cq,), jnp.float32),
        "wk": scale * jax.random.normal(k3, (Cq, C), jnp.float32),
        "bk": scale * jax.random.normal(k4, (Cq,), jnp.float32),
        "wv": scale * jax.random.normal(k5, (C, C), jnp.float32),
        "bv": scale * jax.random.normal(k6, (C,), jnp.float32),
        "gamma": jnp.zeros((1,), jnp.float32),     # nn.Parameter(torch.zeros(1))
    }


def _reference_forward(x_nchw, params, with_attention=False):
    """Pure-JAX f32 reference mirroring the PyTorch forward, for validation."""
    B, C, H, W = x_nchw.shape
    N = H * W
    xf = x_nchw.reshape(B, C, N)
    q = jnp.einsum("oc,bcn->bon", params["wq"], xf) + params["bq"][None, :, None]
    k = jnp.einsum("oc,bcn->bon", params["wk"], xf) + params["bk"][None, :, None]
    v = jnp.einsum("oc,bcn->bon", params["wv"], xf) + params["bv"][None, :, None]
    energy = jnp.einsum("bdn,bdm->bnm", q, k)                      # (B, N, N)
    attn = jax.nn.softmax(energy, axis=-1)
    out = jnp.einsum("bcm,bnm->bcn", v, attn).reshape(B, C, H, W)
    out = params["gamma"][0] * out + x_nchw
    return (out, attn) if with_attention else out


if __name__ == "__main__":
    B, C, H, W = 2, 32, 8, 8          # Cq = C // 8 = 4, N = 64
    key = jax.random.PRNGKey(0)
    kx, kp = jax.random.split(key)
    x = jax.random.normal(kx, (B, C, H, W), jnp.float32)
    params = init_params(kp, C)
    # The module initializes gamma to 0 (attention branch contributes nothing);
    # use a nonzero gamma here so the test actually exercises the attention path.
    params = dict(params, gamma=jnp.full((1,), 0.5, jnp.float32))

    fwd_attn = jax.jit(functools.partial(self_attn_forward, with_attention=True))
    out, attn = fwd_attn(x, params)
    jax.block_until_ready((out, attn))

    fwd_noattn = jax.jit(self_attn_forward)      # no N^2 attention writeback
    out2 = jax.block_until_ready(fwd_noattn(x, params))

    ref_out, ref_attn = _reference_forward(x, params, with_attention=True)
    # bf16 MXU inputs (f32 accumulation) + approx reciprocal -> loosened tolerances.
    assert jnp.allclose(out, ref_out, atol=3e-2, rtol=3e-2), \
        float(jnp.max(jnp.abs(out - ref_out)))
    assert jnp.allclose(attn, ref_attn, atol=5e-3, rtol=5e-2), \
        float(jnp.max(jnp.abs(attn - ref_attn)))
    assert jnp.allclose(out2, ref_out, atol=3e-2, rtol=3e-2), \
        float(jnp.max(jnp.abs(out2 - ref_out)))

    print("KERNEL_OK")
</pallas_src>

<mosaic_0001>
module attributes {stable_mosaic.version = 11 : i64} {
  func.func @_self_attn_kernel(%arg0: i32, %arg1: i32, %arg2: memref<1x32x64xf32, #tpu.memory_space<vmem>>, %arg3: memref<1x32x64xf32, #tpu.memory_space<vmem>>, %arg4: memref<4x32xbf16, #tpu.memory_space<vmem>>, %arg5: memref<4x1xf32, #tpu.memory_space<vmem>>, %arg6: memref<4x32xbf16, #tpu.memory_space<vmem>>, %arg7: memref<4x1xf32, #tpu.memory_space<vmem>>, %arg8: memref<32x32xbf16, #tpu.memory_space<vmem>>, %arg9: memref<32x1xf32, #tpu.memory_space<vmem>>, %arg10: memref<1xf32, #tpu.memory_space<smem>>, %arg11: memref<1x32x64xf32, #tpu.memory_space<vmem>>, %arg12: memref<1x64x64xf32, #tpu.memory_space<vmem>>, %arg13: memref<4x64xf32, #tpu.memory_space<vmem>>, %arg14: memref<32x64xbf16, #tpu.memory_space<vmem>>) attributes {dimension_semantics = [#tpu.dimension_semantics<parallel>, #tpu.dimension_semantics<arbitrary>], iteration_bounds = array<i64: 2, 1>, scalar_prefetch = 0 : i64, scratch_operands = 2 : i64, tpu.core_type = #tpu.core_type<tc>, window_params = [{transform_indices = @transform_0, window_bounds = array<i64: 1, 32, 64>}, {transform_indices = @transform_1, window_bounds = array<i64: 1, 32, 64>}, {pipeline_mode = #tpu.pipeline_mode<synchronous>, transform_indices = @transform_2, window_bounds = array<i64: 4, 32>}, {pipeline_mode = #tpu.pipeline_mode<synchronous>, transform_indices = @transform_3, window_bounds = array<i64: 4, 1>}, {pipeline_mode = #tpu.pipeline_mode<synchronous>, transform_indices = @transform_4, window_bounds = array<i64: 4, 32>}, {pipeline_mode = #tpu.pipeline_mode<synchronous>, transform_indices = @transform_5, window_bounds = array<i64: 4, 1>}, {pipeline_mode = #tpu.pipeline_mode<synchronous>, transform_indices = @transform_6, window_bounds = array<i64: 32, 32>}, {pipeline_mode = #tpu.pipeline_mode<synchronous>, transform_indices = @transform_7, window_bounds = array<i64: 32, 1>}, {transform_indices = @transform_8, window_bounds = array<i64: 1>}, {transform_indices = @transform_9, window_bounds = array<i64: 1, 32, 64>}, {transform_indices = @transform_10, window_bounds = array<i64: 1, 64, 64>}]} {
    %c0_i32 = arith.constant 0 : i32
    %0 = arith.cmpi eq, %arg1, %c0_i32 : i32
    %1 = arith.extui %0 : i1 to i32
    %c0_i32_0 = arith.constant 0 : i32
    %2 = arith.cmpi ne, %1, %c0_i32_0 : i32
    scf.if %2 {
      %c0_22 = arith.constant 0 : index
      %c0_23 = arith.constant 0 : index
      %c0_24 = arith.constant 0 : index
      %36 = vector.load %arg3[%c0_22, %c0_23, %c0_24] : memref<1x32x64xf32, #tpu.memory_space<vmem>>, vector<1x32x64xf32>
      %37 = vector.shape_cast %36 : vector<1x32x64xf32> to vector<32x64xf32>
      %38 = arith.truncf %37 : vector<32x64xf32> to vector<32x64xbf16>
      %c0_25 = arith.constant 0 : index
      %c0_26 = arith.constant 0 : index
      %39 = vector.load %arg6[%c0_25, %c0_26] : memref<4x32xbf16, #tpu.memory_space<vmem>>, vector<4x32xbf16>
      %cst_27 = arith.constant dense<0.000000e+00> : vector<4x64xf32>
      %40 = tpu.matmul %39, %38, %cst_27 {dimension_numbers = #tpu.dot_dimension_numbers<[1], [0], [0], [1], [0, 0, 1, 1], [], []>} : vector<4x32xbf16>, vector<32x64xbf16>, vector<4x64xf32> -> vector<4x64xf32>
      %c0_28 = arith.constant 0 : index
      %c0_29 = arith.constant 0 : index
      %41 = vector.load %arg7[%c0_28, %c0_29] : memref<4x1xf32, #tpu.memory_space<vmem>>, vector<4x1xf32>
      %42 = vector.broadcast %41 : vector<4x1xf32> to vector<4x64xf32>
      %43 = arith.addf %40, %42 : vector<4x64xf32>
      %c0_30 = arith.constant 0 : index
      %c0_31 = arith.constant 0 : index
      %44 = vector.load %arg8[%c0_30, %c0_31] : memref<32x32xbf16, #tpu.memory_space<vmem>>, vector<32x32xbf16>
      %cst_32 = arith.constant dense<0.000000e+00> : vector<32x64xf32>
      %45 = tpu.matmul %44, %38, %cst_32 {dimension_numbers = #tpu.dot_dimension_numbers<[1], [0], [0], [1], [0, 0, 1, 1], [], []>} : vector<32x32xbf16>, vector<32x64xbf16>, vector<32x64xf32> -> vector<32x64xf32>
      %c0_33 = arith.constant 0 : index
      %c0_34 = arith.constant 0 : index
      %46 = vector.load %arg9[%c0_33, %c0_34] : memref<32x1xf32, #tpu.memory_space<vmem>>, vector<32x1xf32>
      %47 = vector.broadcast %46 : vector<32x1xf32> to vector<32x64xf32>
      %48 = arith.addf %45, %47 : vector<32x64xf32>
      %c0_35 = arith.constant 0 : index
      %c0_36 = arith.constant 0 : index
      %49 = vector.load %arg13[%c0_35, %c0_36] : memref<4x64xf32, #tpu.memory_space<vmem>>, vector<4x64xf32>
      tpu.vector_store %arg13[%c0_35, %c0_36], %43 {strides = array<i32>} : memref<4x64xf32, #tpu.memory_space<vmem>>, vector<4x64xf32>,
      %50 = arith.truncf %48 : vector<32x64xf32> to vector<32x64xbf16>
      %c0_37 = arith.constant 0 : index
      %c0_38 = arith.constant 0 : index
      %51 = vector.load %arg14[%c0_37, %c0_38] : memref<32x64xbf16, #tpu.memory_space<vmem>>, vector<32x64xbf16>
      tpu.vector_store %arg14[%c0_37, %c0_38], %50 {strides = array<i32>} : memref<32x64xbf16, #tpu.memory_space<vmem>>, vector<32x64xbf16>,
    } else {
    }
    %c0 = arith.constant 0 : index
    %c0_1 = arith.constant 0 : index
    %c0_2 = arith.constant 0 : index
    %3 = vector.load %arg2[%c0, %c0_1, %c0_2] : memref<1x32x64xf32, #tpu.memory_space<vmem>>, vector<1x32x64xf32>
    %4 = vector.shape_cast %3 : vector<1x32x64xf32> to vector<32x64xf32>
    %c0_3 = arith.constant 0 : index
    %c0_4 = arith.constant 0 : index
    %5 = vector.load %arg4[%c0_3, %c0_4] : memref<4x32xbf16, #tpu.memory_space<vmem>>, vector<4x32xbf16>
    %6 = arith.truncf %4 : vector<32x64xf32> to vector<32x64xbf16>
    %cst = arith.constant dense<0.000000e+00> : vector<4x64xf32>
    %7 = tpu.matmul %5, %6, %cst {dimension_numbers = #tpu.dot_dimension_numbers<[1], [0], [0], [1], [0, 0, 1, 1], [], []>} : vector<4x32xbf16>, vector<32x64xbf16>, vector<4x64xf32> -> vector<4x64xf32>
    %c0_5 = arith.constant 0 : index
    %c0_6 = arith.constant 0 : index
    %8 = vector.load %arg5[%c0_5, %c0_6] : memref<4x1xf32, #tpu.memory_space<vmem>>, vector<4x1xf32>
    %9 = vector.broadcast %8 : vector<4x1xf32> to vector<4x64xf32>
    %10 = arith.addf %7, %9 : vector<4x64xf32>
    %c0_7 = arith.constant 0 : index
    %c0_8 = arith.constant 0 : index
    %11 = vector.load %arg13[%c0_7, %c0_8] : memref<4x64xf32, #tpu.memory_space<vmem>>, vector<4x64xf32>
    %cst_9 = arith.constant dense<0.000000e+00> : vector<64x64xf32>
    %12 = tpu.matmul %10, %11, %cst_9 {dimension_numbers = #tpu.dot_dimension_numbers<[0], [0], [1], [1], [0, 1, 1, 1], [], []>} : vector<4x64xf32>, vector<4x64xf32>, vector<64x64xf32> -> vector<64x64xf32>
    %cst_10 = arith.constant dense<0xFF800000> : vector<64xf32>
    %13 = vector.multi_reduction <maximumf>, %12, %cst_10 [1] : vector<64x64xf32> to vector<64xf32>
    %14 = vector.shape_cast %13 : vector<64xf32> to vector<64x1xf32>
    %15 = vector.broadcast %14 : vector<64x1xf32> to vector<64x64xf32>
    %16 = arith.subf %12, %15 : vector<64x64xf32>
    %17 = math.exp %16 : vector<64x64xf32>
    %cst_11 = arith.constant dense<0.000000e+00> : vector<64xf32>
    %18 = vector.multi_reduction <add>, %17, %cst_11 [1] : vector<64x64xf32> to vector<64xf32>
    %19 = vector.shape_cast %18 : vector<64xf32> to vector<64x1xf32>
    %20 = tpu.reciprocal %19 {approx = true} : vector<64x1xf32> -> vector<64x1xf32>
    %21 = vector.broadcast %20 : vector<64x1xf32> to vector<64x64xf32>
    %22 = arith.mulf %17, %21 : vector<64x64xf32>
    %c0_12 = arith.constant 0 : index
    %c0_13 = arith.constant 0 : index
    %23 = vector.load %arg14[%c0_12, %c0_13] : memref<32x64xbf16, #tpu.memory_space<vmem>>, vector<32x64xbf16>
    %24 = arith.truncf %22 : vector<64x64xf32> to vector<64x64xbf16>
    %cst_14 = arith.constant dense<0.000000e+00> : vector<32x64xf32>
    %25 = tpu.matmul %23, %24, %cst_14 {dimension_numbers = #tpu.dot_dimension_numbers<[1], [1], [0], [0], [0, 0, 1, 0], [], []>} : vector<32x64xbf16>, vector<64x64xbf16>, vector<32x64xf32> -> vector<32x64xf32>
    %c0_15 = arith.constant 0 : index
    %26 = memref.load %arg10[%c0_15] : memref<1xf32, #tpu.memory_space<smem>>
    %27 = vector.broadcast %26 : f32 to vector<32x64xf32>
    %28 = arith.mulf %27, %25 : vector<32x64xf32>
    %29 = arith.addf %28, %4 : vector<32x64xf32>
    %c0_16 = arith.constant 0 : index
    %c0_17 = arith.constant 0 : index
    %c0_18 = arith.constant 0 : index
    %30 = vector.load %arg11[%c0_16, %c0_17, %c0_18] : memref<1x32x64xf32, #tpu.memory_space<vmem>>, vector<1x32x64xf32>
    %31 = vector.shape_cast %30 : vector<1x32x64xf32> to vector<32x64xf32>
    %32 = vector.shape_cast %29 : vector<32x64xf32> to vector<1x32x64xf32>
    tpu.vector_store %arg11[%c0_16, %c0_17, %c0_18], %32 {strides = array<i32>} : memref<1x32x64xf32, #tpu.memory_space<vmem>>, vector<1x32x64xf32>,
    %c0_19 = arith.constant 0 : index
    %c0_20 = arith.constant 0 : index
    %c0_21 = arith.constant 0 : index
    %33 = vector.load %arg12[%c0_19, %c0_20, %c0_21] : memref<1x64x64xf32, #tpu.memory_space<vmem>>, vector<1x64x64xf32>
    %34 = vector.shape_cast %33 : vector<1x64x64xf32> to vector<64x64xf32>
    %35 = vector.shape_cast %22 : vector<64x64xf32> to vector<1x64x64xf32>
    tpu.vector_store %arg12[%c0_19, %c0_20, %c0_21], %35 {strides = array<i32>} : memref<1x64x64xf32, #tpu.memory_space<vmem>>, vector<1x64x64xf32>,
    return
  }
  func.func @transform_0(%arg0: i32, %arg1: i32) -> (i32, i32, i32) {
    %c0_i32 = arith.constant 0 : i32
    %c0_i32_0 = arith.constant 0 : i32
    return %arg0, %c0_i32, %arg1 : i32, i32, i32
  }
  func.func @transform_1(%arg0: i32, %arg1: i32) -> (i32, i32, i32) {
    %c0_i32 = arith.constant 0 : i32
    %c0_i32_0 = arith.constant 0 : i32
    %c0_i32_1 = arith.constant 0 : i32
    return %arg0, %c0_i32, %c0_i32_0 : i32, i32, i32
  }
  func.func @transform_2(%arg0: i32, %arg1: i32) -> (i32, i32) {
    %c0_i32 = arith.constant 0 : i32
    %c0_i32_0 = arith.constant 0 : i32
    %c0_i32_1 = arith.constant 0 : i32
    return %c0_i32, %c0_i32_0 : i32, i32
  }
  func.func @transform_3(%arg0: i32, %arg1: i32) -> (i32, i32) {
    %c0_i32 = arith.constant 0 : i32
    %c0_i32_0 = arith.constant 0 : i32
    %c0_i32_1 = arith.constant 0 : i32
    return %c0_i32, %c0_i32_0 : i32, i32
  }
  func.func @transform_4(%arg0: i32, %arg1: i32) -> (i32, i32) {
    %c0_i32 = arith.constant 0 : i32
    %c0_i32_0 = arith.constant 0 : i32
    %c0_i32_1 = arith.constant 0 : i32
    return %c0_i32, %c0_i32_0 : i32, i32
  }
  func.func @transform_5(%arg0: i32, %arg1: i32) -> (i32, i32) {
    %c0_i32 = arith.constant 0 : i32
    %c0_i32_0 = arith.constant 0 : i32
    %c0_i32_1 = arith.constant 0 : i32
    return %c0_i32, %c0_i32_0 : i32, i32
  }
  func.func @transform_6(%arg0: i32, %arg1: i32) -> (i32, i32) {
    %c0_i32 = arith.constant 0 : i32
    %c0_i32_0 = arith.constant 0 : i32
    %c0_i32_1 = arith.constant 0 : i32
    return %c0_i32, %c0_i32_0 : i32, i32
  }
  func.func @transform_7(%arg0: i32, %arg1: i32) -> (i32, i32) {
    %c0_i32 = arith.constant 0 : i32
    %c0_i32_0 = arith.constant 0 : i32
    %c0_i32_1 = arith.constant 0 : i32
    return %c0_i32, %c0_i32_0 : i32, i32
  }
  func.func @transform_8(%arg0: i32, %arg1: i32) -> i32 {
    %c0_i32 = arith.constant 0 : i32
    %c0_i32_0 = arith.constant 0 : i32
    return %c0_i32 : i32
  }
  func.func @transform_9(%arg0: i32, %arg1: i32) -> (i32, i32, i32) {
    %c0_i32 = arith.constant 0 : i32
    %c0_i32_0 = arith.constant 0 : i32
    return %arg0, %c0_i32, %arg1 : i32, i32, i32
  }
  func.func @transform_10(%arg0: i32, %arg1: i32) -> (i32, i32, i32) {
    %c0_i32 = arith.constant 0 : i32
    %c0_i32_0 = arith.constant 0 : i32
    return %arg0, %arg1, %c0_i32 : i32, i32, i32
  }
}

</mosaic_0001>

<bundles_post_ra>
// kernel: self_attn_forward.1
= control target key start
LH: loop header
LB: loop body
LE: loop exit
PB: predicated region body
PF: predicated region fallthrough
CT: control target
= control target key end

     0   :  { %s1762_s0 = inlined_call_operand.vmem [shape: f32[2,32,64], index: 0, kind: input, shape index: {}, may-alias: {0,1}]   ;;  %s1763_s1 = inlined_call_operand.vmem [shape: f32[2,32,64], index: 1, kind: input, shape index: {}, may-alias: {0,1}]   ;;  %s1764_s2 = inlined_call_operand.vmem [shape: bf16[4,32], index: 2, kind: input, shape index: {}]   ;;  %s1765_s3 = inlined_call_operand.vmem [shape: f32[4,1], index: 3, kind: input, shape index: {}]   ;;  %s1766_s4 = inlined_call_operand.vmem [shape: bf16[4,32], index: 4, kind: input, shape index: {}]   ;;  %s1767_s5 = inlined_call_operand.vmem [shape: f32[4,1], index: 5, kind: input, shape index: {}]   ;;  %s1768_s6 = inlined_call_operand.vmem [shape: bf16[32,32], index: 6, kind: input, shape index: {}]   ;;  %s1769_s7 = inlined_call_operand.vmem [shape: f32[32,1], index: 7, kind: input, shape index: {}]   ;;  %s1770_s8 = inlined_call_operand.<no memory space> [shape: f32[1], index: 8, kind: input, shape index: {}]   ;;  %s1771_s9 = inlined_call_operand.vmem [shape: f32[2,32,64], index: 9, kind: output, shape index: {0}]   ;;  %s1772_s10 = inlined_call_operand.hbm [shape: f32[2,64,64], index: 10, kind: output, shape index: {1}]  }
   0x1   :  { %16 = sst [smem:[#allocation4]] %s1770_s8 }
   0x2   :  { %17 = vsyncpa [#allocation6], 0 }
   0x3   :  { %19 = vsyncpa [#allocation6 + $0x1], 0  ;;  %s1507_s15 = smov 0   ;;  %s1509_s16 = smov 0  }
   0x4   :  { %s1511_s17 = smov 0   ;;  %s1513_s18 = smov 0  }
   0x5   :  { %s1515_s19 = smov 0   ;;  %s1517_s20 = smov 0  }
   0x6 LB: > { %s1150_s8 = sadd.s32 4294967295, %s1441_s20   ;;  %s1151_s21 = sadd.s32 4294967294, %s1441_s20   ;;  %s1441_s20 = sphi %s1517_s20, %s25_s20   ;;  %s1437_s19 = sphi %s1515_s19, %s1779_s19   ;;  %s1433_s18 = sphi %s1513_s18, %s1778_s18   ;;  %s1429_s17 = sphi %s1511_s17, %s1777_s17   ;;  %s1425_s16 = sphi %s1509_s16, %s1776_s16   ;;  %s1421_s15 = sphi %s1507_s15, %s1775_s15  }
   0x7   : > { %s37_s22 = sadd.s32 1, %s1437_s19  ;;  %s275_s23 = sadd.s32 1, %s1429_s17 }
   0x8   : > { %p39_p0 = scmp.ge.s32.totalorder %s37_s22, 2  ;;  %p285_p1 = scmp.ne.s32.totalorder %s1429_s17, %s1425_s16 }
   0x9   : > { %p286_p2 = scmp.eq.s32.totalorder %s1150_s8, 1  ;;  %p291_p3 = scmp.ne.s32.totalorder %s1425_s16, %s1421_s15 }
   0xa   : > { %s1781_s22 = smov (%p39_p0, %s37_s22), 0  ;;  %p292_p5 = scmp.eq.s32.totalorder %s1151_s21, 1 }
   0xb   : > { %p1547_p4 = por %p286_p2, %p285_p1  ;;  %s270_s25 = ssub.s32 %s1437_s19, %s1781_s22 }
   0xc   : > { %p1154_p6 = scmp.ge.s32.totalorder %s1441_s20, 1  ;;  %p273_p7 = scmp.eq.s32.totalorder %s270_s25, 0 }
   0xd   : > { %p1554_p8 = por %p292_p5, %p291_p3  ;;  %p350_p9 = scmp.lt.s32.totalorder %s1441_s20, 3 }
   0xe   : > { %s1560_s27 = scalar_select %p273_p7, %s1429_s17, %s275_s23  }
   0xf   : > { %p351_p10 = pnand %p1154_p6, %p350_p9 }
  0x10   : > { %p404_p11 = scmp.lt.s32.totalorder (!%p351_p10), %s1433_s18, 1  ;;  %v1443_v0 = vmov (!%p351_p10), 0.0   ;;  %v595_v1 = vld [vmem:[%s1765_s3] sm:$0xf] (!%p351_p10)  ;;  %vm1444_vm0 = vmmov (!%p351_p10), 0   ;;  %v1445_v2 = vmov (!%p351_p10), 0  }
  0x11   : > { %354 = sbr.rel (%p351_p10) target bundleno = 1172 (0x494), region = 56  ;;  %1213 = vmatprep.subr.bf16.mxu1 (!%p351_p10), %v1443_v0  ;;  %1229 = vmatprep.subr.bf16.mxu0 (!%p351_p10), %v1443_v0  ;;  %v438_v3 = vld [vmem:[%s1767_s5] sm:$0xf] (!%p351_p10)  ;;  %vm444_vm1 = vcmask (!%p351_p10), 261120   ;;  %v1330_v19 = vld [vmem:[%s1768_s6 + $0x8] sm:$0xff] (!%p351_p10)   ;;  %vm581_vm2 = vcmask (!%p351_p10), 519168  }
  0x12   : > { %1217 = vmatprep.mubr.msk.bf16.mxu1 (!%p351_p10), %vm1444_vm0, %v1443_v0  ;;  %1233 = vmatprep.mubr.msk.bf16.mxu0 (!%p351_p10), %vm1444_vm0, %v1443_v0  ;;  %v437_v16 = vld [vmem:[%s1766_s4] sm:$0x3] (!%p351_p10)  ;;  %vm703_vm3 = vcmask (!%p351_p10), 1043456   ;;  %vm678_vm4 = vcmask (!%p351_p10), 31744   ;;  %vm585_vm5 = vcmask (!%p351_p10), 523264   ;;  %s401_s21 = sand.u32 (!%p351_p10), 1, %s1425_s16  }
  0x13   : > { %1327 = vset.pattern.permute.xlu0 (!%p351_p10), %v1445_v2  ;;  %v592_v17 = vld [vmem:[%s1764_s2] sm:$0x3] (!%p351_p10)  ;;  %s1187_s28 = sshll.u32 (!%p351_p10), %s1433_s18, 10 }
  0x14   : > { %598 = vperm.xlu0 (!%p351_p10), %1327, %v595_v1   ;;  %v1329_v18 = vld [vmem:[%s1768_s6] sm:$0xff] (!%p351_p10)   ;;  %s1698_s13 = scalar_lea.hbm (!%p351_p10), %s1772_s10, %s1187_s28 }
  0x18   : > { %s405_s30 = scalar_select %p404_p11, %s1433_s18, 1  ;;  %441 = vperm.xlu0 %1327, %v438_v3  }
  0x19   : > { %s1446_s18 = smov [#allocation5]  }
  0x1a   : > { %s1567_s11 = sshll.u32 %s405_s30, 5 }
  0x1b   : > { %s416_s14 = scalar_lea.vmem %s1763_s1, %s1567_s11  ;;  %s411_s23 = scalar_lea.vmem %s1762_s0, %s1567_s11 }
  0x1c   : > { %v431_v4 = vld [vmem:[%s416_s14] sm:$0xff]  ;;  %v432_v5 = vld [vmem:[%s416_s14 + $0x8] sm:$0xff]  ;;  %v433_v9 = vld [vmem:[%s416_s14 + $0x10] sm:$0xff] }
  0x1d   : > { %v1580_v6 = vld [vmem:[%s411_s23] sm:$0xff]  ;;  %v435_v7 = vpack.c.bf16 %v432_v5, %v431_v4  ;;  %v1582_v8 = vld [vmem:[%s411_s23 + $0x8] sm:$0xff]  ;;  %v434_v10 = vld [vmem:[%s416_s14 + $0x18] sm:$0xff]  ;;  %s1704_s14 = scalar_lea.sflag [#allocation6], %s401_s21 }
  0x1e   : > { %v593_v11 = vpack.c.bf16 %v1582_v8, %v1580_v6  ;;  %v1586_v12 = vld [vmem:[%s411_s23 + $0x10] sm:$0xff]  ;;  %v1588_v13 = vld [vmem:[%s411_s23 + $0x18] sm:$0xff]  ;;  %v436_v14 = vpack.c.bf16 %v434_v10, %v433_v9  ;;  %s1155_s23 = sshll.u32 %s401_s21, 6 }
  0x1f   : > { %1214 = vmatpush3.bf16.msra.mxu1 %v435_v7  ;;  %v594_v15 = vpack.c.bf16 %v1588_v13, %v1586_v12  ;;  %s1657_s25 = scalar_lea.vmem [#allocation5], %s1155_s23  ;;  %s1367_s23 = sshll.u32 %s1446_s18, 4  ;;  %s1368_s23 = int_to_ptr.vmem [resolvable:$false] %s1367_s23 }
  0x20   : > { %1230 = vmatpush3.bf16.msra.mxu0 %v593_v11  ;;  %1215 = vmatprep.subr.bf16.mxu1 %v1443_v0  ;;  %s1023_s29 = sshll.u32 %s1657_s25, 4  ;;  %s1700_s29 = int_to_ptr.vmem [resolvable:$true] %s1023_s29 }
  0x21   : > { %1231 = vmatprep.subr.bf16.mxu0 %v1443_v0  ;;  %s1363_s8 = scalar_lea.vmem %s1700_s29, 1024  ;;  %p1370_p1 = scmp.lt.s32.totalorder %s1700_s29, %s1368_s23 }
  0x22   : > { %p1364_p12 = scmp.ne.s32.totalorder %s1700_s29, %s1363_s8 }
  0x23   : > { %1216 = vmatpush3.bf16.msra.mxu1 %v436_v14 }
  0x24   : > { %1232 = vmatpush3.bf16.msra.mxu0 %v594_v15  ;;  %1221 = vmatprep.subr.bf16.mxu1 %v435_v7  ;;  %p1365_p13 = pnand %p1364_p12, %p1547_p4 }
  0x26   : > { %1218 = vmatmul.mubr.msk.bf16.vlgmr.msra.gmra.mrb[0].mxu1 %vm444_vm1, %v437_v16  ;;  %p1366_p0 = pneg %p1365_p13 }
  0x27   : > { %1234 = vmatmul.mubr.msk.bf16.vlgmr.msra.gmra.mrb[0].mxu0 %vm444_vm1, %v592_v17  ;;  %1222 = vmatpush3.bf16.msra.mxu1 %v435_v7 }
  0x28   : > { %1223 = vmatprep.subr.bf16.mxu1 %v436_v14  ;;  %1225 = vmatprep.mubr.msk.bf16.mxu1 %vm444_vm1, %v1329_v18 }
  0x2b   : > { %1224 = vmatpush3.bf16.msra.mxu1 %v436_v14 }
  0x2e   : > { %1226 = vmatmul.mubr.msk.bf16.vlgmr.msra.gmra.mrb[4].mxu1 %vm444_vm1, %v1330_v19 }
  0x93   : > { %v599_v20 = vpop.permute.xlu0 %598 }
  0x97   : > { %v442_v21 = vpop.permute.xlu0 %441 }
  0xf9   : > { %v482_v22 = vpop.f32.mrb[0].mxu1 }
  0xfa   : > { %v483_v23 = vadd.f32 %v482_v22, %v442_v21  ;;  %v639_v24 = vpop.f32.mrb[0].mxu0  ;;  %v1219_v25 = vpop.f32.mrb[1].mxu1 }
  0xfb   : > { %v1235_v26 = vpop.f32.mrb[1].mxu0  ;;  %v640_v27 = vadd.f32 %v639_v24, %v599_v20  ;;  %v485_v28 = vpop.f32.mrb[2].mxu1 }
  0xfc   : > { %582 = vst.msk [vmem:[#allocation2] sm:$0xf] %vm581_vm2, %v483_v23  ;;  %v642_v29 = vpop.f32.mrb[2].mxu0  ;;  %v1220_v30 = vpop.f32.mrb[3].mxu1 }
  0xfd   : > { %646 = vxpose.xlu1.b32.start.end [1/1] (short) (narrow) %v640_v27, 64  ;;  %v1236_v31 = vpop.f32.mrb[3].mxu0 }
 0x101   : > { %v1604_v33 = vpop.f32.mrb[4].mxu1 }
 0x102   : > { %v1606_v34 = vpop.f32.mrb[5].mxu1 }
 0x103   : > { %v645_v32 = vld [vmem:[#allocation2] sm:$0xf]  ;;  %v1608_v35 = vpop.f32.mrb[6].mxu1 }
 0x104   : > { %1237 = vmatprep.subr.msk.mxu1 %vm703_vm3, %v645_v32  ;;  %v1610_v36 = vpop.f32.mrb[7].mxu1 }
 0x105   : > { %1238 = vmatpush3.msk.msra.mxu1 %vm703_vm3, %v645_v32 }
 0x11b   : > { %1328 = vset.pattern.permute.xlu1 %v1445_v2 }
 0x17d   : > { %v662_v37 = vpop.trf.xlu1 }
 0x17e   : > { %1239 = vmatprep.mubr.msk.f32.mxu1 %vm678_vm4, %v662_v37 }
 0x181   : > { %v663_v38 = vpop.trf.xlu1 }
 0x182   : > { %1240 = vmatmul.mubr.msk.f32.vlgmr.msra.gmra.mrb[8].mxu1 %vm678_vm4, %v663_v38 }
 0x185   : > { %v664_v39 = vpop.trf.xlu1 }
 0x186   : > { %1242 = vmatprep.mubr.msk.f32.mxu1 %vm678_vm4, %v664_v39 }
 0x189   : > { %v665_v40 = vpop.trf.xlu1 }
 0x18a   : > { %1243 = vmatmul.mubr.msk.f32.gmra.mrb[10].mxu1 %vm678_vm4, %v665_v40 }
 0x18d   : > { %v666_v41 = vpop.trf.xlu1 }
 0x18e   : > { %1245 = vmatprep.mubr.msk.f32.mxu1 %vm678_vm4, %v666_v41 }
 0x191   : > { %v667_v42 = vpop.trf.xlu1 }
 0x192   : > { %1246 = vmatmul.mubr.msk.f32.gmra.mrb[12].mxu1 %vm678_vm4, %v667_v42 }
 0x195   : > { %v668_v43 = vpop.trf.xlu1 }
 0x196   : > { %1248 = vmatprep.mubr.msk.f32.mxu1 %vm678_vm4, %v668_v43 }
 0x199   : > { %v669_v44 = vpop.trf.xlu1 }
 0x19a   : > { %1249 = vmatmul.mubr.msk.f32.gmra.mrb[14].mxu1 %vm678_vm4, %v669_v44 }
 0x255   : > { %v1241_v45 = vpop.f32.mrb[8].mxu1 }
 0x256   : > { %v773_v46 = vpop.f32.mrb[9].mxu1  ;;  %v816_v47 = vsel %vm585_vm5, %v1241_v45, -inf }
 0x257   : > { %817 = vmax.xlane.f32.xlu0 %v816_v47  ;;  %v813_v48 = vsel %vm585_vm5, %v773_v46, -inf  ;;  %v494_v47 = vld [vmem:[%s1769_s7 + $0x10] sm:$0xff] }
 0x258   : > { %814 = vmax.xlane.f32.xlu1 %v813_v48  ;;  %v495_v48 = vld [vmem:[%s1769_s7 + $0x18] sm:$0xff] }
 0x25d   : > { %v1244_v49 = vpop.f32.mrb[10].mxu1 }
 0x25e   : > { %v783_v50 = vpop.f32.mrb[11].mxu1  ;;  %v822_v51 = vsel %vm585_vm5, %v1244_v49, -inf }
 0x25f   : > { %823 = vmax.xlane.f32.xlu0 %v822_v51  ;;  %v819_v52 = vsel %vm585_vm5, %v783_v50, -inf }
 0x263   : > { %820 = vmax.xlane.f32.xlu0 %v819_v52 }
 0x265   : > { %v1247_v53 = vpop.f32.mrb[12].mxu1 }
 0x266   : > { %v793_v54 = vpop.f32.mrb[13].mxu1  ;;  %v828_v55 = vsel %vm585_vm5, %v1247_v53, -inf }
 0x267   : > { %829 = vmax.xlane.f32.xlu0 %v828_v55  ;;  %v825_v56 = vsel %vm585_vm5, %v793_v54, -inf }
 0x26b   : > { %826 = vmax.xlane.f32.xlu0 %v825_v56 }
 0x26d   : > { %v1250_v57 = vpop.f32.mrb[14].mxu1 }
 0x26e   : > { %v803_v58 = vpop.f32.mrb[15].mxu1  ;;  %v834_v60 = vsel %vm585_vm5, %v1250_v57, -inf }
 0x26f   : > { %v831_v59 = vsel %vm585_vm5, %v803_v58, -inf }
 0x270   : > { %832 = vmax.xlane.f32.xlu0 %v831_v59 }
 0x274   : > { %835 = vmax.xlane.f32.xlu0 %v834_v60 }
 0x2e4   : > { %v818_v61 = vpop.xlane.xlu0 %817 }
 0x2e5   : > { %v838_v62 = vsub.f32 %v1241_v45, %v818_v61  ;;  %v815_v63 = vpop.xlane.xlu1 %814  ;;  %v493_v45 = vld [vmem:[%s1769_s7 + $0x8] sm:$0xff] }
 0x2e6   : > { %v837_v0 = vsub.f32 %v773_v46, %v815_v63  ;;  %v492_v46 = vld [vmem:[%s1769_s7] sm:$0xff] }
 0x2e7   : > { %v847_v1 = vmul.f32 1.442695, %v838_v62 }
 0x2e8   : > { %v845_v2 = vmul.f32 1.442695, %v837_v0 }
 0x2e9   : > { %1331 = vpow2.f32 %v847_v1 }
 0x2ea   : > { %1333 = vpow2.f32 %v845_v2 }
 0x2ec   : > { %v824_v3 = vpop.xlane.xlu0 %823 }
 0x2ed   : > { %v840_v4 = vsub.f32 %v1244_v49, %v824_v3 }
 0x2ef   : > { %v851_v5 = vmul.f32 1.442695, %v840_v4 }
 0x2f0   : > { %v821_v7 = vpop.xlane.xlu0 %820 }
 0x2f1   : > { %1335 = vpow2.f32 %v851_v5  ;;  %v839_v9 = vsub.f32 %v783_v50, %v821_v7 }
 0x2f3   : > { %v1332_v10 = vpop.eup %1331  ;;  %v849_v11 = vmul.f32 1.442695, %v839_v9 }
 0x2f4   : > { %v830_v14 = vpop.xlane.xlu0 %829  ;;  %v864_v15 = vsel %vm585_vm5, %v1332_v10, 0.0  ;;  %v1334_v16 = vpop.eup %1333 }
 0x2f5   : > { %1337 = vpow2.f32 %v849_v11  ;;  %v842_v17 = vsub.f32 %v1247_v53, %v830_v14  ;;  %865 = vadd.xlane.f32.xlu0 %v864_v15  ;;  %v861_v20 = vsel %vm585_vm5, %v1334_v16, 0.0 }
 0x2f7   : > { %v855_v18 = vmul.f32 1.442695, %v842_v17 }
 0x2f8   : > { %v827_v19 = vpop.xlane.xlu0 %826 }
 0x2f9   : > { %1339 = vpow2.f32 %v855_v18  ;;  %v841_v21 = vsub.f32 %v793_v54, %v827_v19  ;;  %862 = vadd.xlane.f32.xlu0 %v861_v20 }
 0x2fb   : > { %v1336_v22 = vpop.eup %1335  ;;  %v853_v23 = vmul.f32 1.442695, %v841_v21 }
 0x2fc   : > { %v870_v24 = vsel %vm585_vm5, %v1336_v22, 0.0 }
 0x2fd   : > { %1341 = vpow2.f32 %v853_v23  ;;  %871 = vadd.xlane.f32.xlu1 %v870_v24  ;;  %v833_v25 = vpop.xlane.xlu0 %832 }
 0x2fe   : > { %v843_v26 = vsub.f32 %v803_v58, %v833_v25 }
 0x2ff   : > { %v1338_v27 = vpop.eup %1337 }
 0x300   : > { %v857_v28 = vmul.f32 1.442695, %v843_v26  ;;  %v867_v29 = vsel %vm585_vm5, %v1338_v27, 0.0 }
 0x301   : > { %v836_v30 = vpop.xlane.xlu0 %835  ;;  %868 = vadd.xlane.f32.xlu0 %v867_v29 }
 0x302   : > { %1343 = vpow2.f32 %v857_v28  ;;  %v844_v31 = vsub.f32 %v1250_v57, %v836_v30 }
 0x303   : > { %v1340_v32 = vpop.eup %1339 }
 0x304   : > { %v859_v37 = vmul.f32 1.442695, %v844_v31  ;;  %v876_v38 = vsel %vm585_vm5, %v1340_v32, 0.0 }
 0x305   : > { %877 = vadd.xlane.f32.xlu1 %v876_v38 }
 0x306   : > { %1345 = vpow2.f32 %v859_v37 }
 0x307   : > { %v1342_v39 = vpop.eup %1341 }
 0x308   : > { %v873_v40 = vsel %vm585_vm5, %v1342_v39, 0.0 }
 0x309   : > { %874 = vadd.xlane.f32.xlu0 %v873_v40 }
 0x30c   : > { %v1634_v41 = vpop.eup %1343 }
 0x30d   : > { %v879_v42 = vsel %vm585_vm5, %v1634_v41, 0.0 }
 0x30e   : > { %880 = vadd.xlane.f32.xlu0 %v879_v42 }
 0x310   : > { %v1638_v43 = vpop.eup %1345 }
 0x311   : > { %v882_v44 = vsel %vm585_vm5, %v1638_v43, 0.0 }
 0x312   : > { %883 = vadd.xlane.f32.xlu1 %v882_v44 }
 0x323   : > { %503 = vperm.xlu1 %1328, %v493_v45  }
 0x324   : > { %498 = vperm.xlu0 %1327, %v492_v46  }
 0x327   : > { %508 = vperm.xlu1 %1328, %v494_v47  }
 0x32b   : > { %513 = vperm.xlu1 %1328, %v495_v48  }
 0x382   : > { %v866_v49 = vpop.xlane.xlu0 %865 }
 0x383   : > { %1347 = vrcp.f32 %v866_v49 }
 0x386   : > { %v863_v50 = vpop.xlane.xlu0 %862 }
 0x387   : > { %1349 = vrcp.f32 %v863_v50 }
 0x38a   : > { %v872_v51 = vpop.xlane.xlu1 %871 }
 0x38b   : > { %1351 = vrcp.f32 %v872_v51 }
 0x38d   : > { %v1348_v52 = vpop.eup %1347 }
 0x38e   : > { %v869_v53 = vpop.xlane.xlu0 %868  ;;  %v894_v54 = vmul.f32 %v1348_v52, %v1332_v10 }
 0x38f   : > { %1353 = vrcp.f32 %v869_v53 }
 0x390   : > { %989 = vst.msk [vmem:[%s1657_s25 + $0x8] sm:$0xff] %vm585_vm5, %v894_v54 }
 0x391   : > { %v1350_v55 = vpop.eup %1349 }
 0x392   : > { %v878_v56 = vpop.xlane.xlu1 %877  ;;  %v893_v57 = vmul.f32 %v1350_v55, %v1334_v16 }
 0x393   : > { %1355 = vrcp.f32 %v878_v56 }
 0x394   : > { %v903_v58 = vpack.c.bf16 %v894_v54, %v893_v57  ;;  %988 = vst.msk [vmem:[%s1657_s25] sm:$0xff] %vm585_vm5, %v893_v57 }
 0x395   : > { %v1352_v59 = vpop.eup %1351 }
 0x396   : > { %1263 = vmatprep.subr.msk.bf16.mxu0 %vm585_vm5, %v903_v58  ;;  %v875_v60 = vpop.xlane.xlu0 %874  ;;  %v914_v61 = vsel %vm585_vm5, %v903_v58, 0  ;;  %v896_v62 = vmul.f32 %v1352_v59, %v1336_v22 }
 0x397   : > { %1357 = vrcp.f32 %v875_v60  ;;  %1252 = vmatpush3.bf16.xpose.msra.mxu0 %v914_v61 }
 0x398   : > { %991 = vst.msk [vmem:[%s1657_s25 + $0x18] sm:$0xff] %vm585_vm5, %v896_v62 }
 0x399   : > { %v1354_v63 = vpop.eup %1353 }
 0x39a   : > { %v895_v0 = vmul.f32 %v1354_v63, %v1338_v27 }
 0x39b   : > { %v881_v1 = vpop.xlane.xlu0 %880 }
 0x39c   : > { %1359 = vrcp.f32 %v881_v1  ;;  %v904_v2 = vpack.c.bf16 %v896_v62, %v895_v0  ;;  %990 = vst.msk [vmem:[%s1657_s25 + $0x10] sm:$0xff] %vm585_vm5, %v895_v0 }
 0x39d   : > { %v1356_v3 = vpop.eup %1355 }
 0x39e   : > { %1264 = vmatprep.subr.msk.bf16.mxu0 %vm585_vm5, %v904_v2  ;;  %v917_v4 = vsel %vm585_vm5, %v904_v2, 0  ;;  %v898_v5 = vmul.f32 %v1356_v3, %v1340_v32 }
 0x39f   : > { %1254 = vmatpush3.bf16.xpose.msra.mxu0 %v917_v4  ;;  %v884_v7 = vpop.xlane.xlu1 %883 }
 0x3a0   : > { %1361 = vrcp.f32 %v884_v7  ;;  %993 = vst.msk [vmem:[%s1657_s25 + $0x28] sm:$0xff] %vm585_vm5, %v898_v5 }
 0x3a1   : > { %v1358_v9 = vpop.eup %1357 }
 0x3a2   : > { %v897_v10 = vmul.f32 %v1358_v9, %v1342_v39 }
 0x3a3   : > { %v499_v11 = vpop.permute.xlu0 %498  ;;  %v504_v14 = vpop.permute.xlu1 %503 }
 0x3a4   : > { %v567_v15 = vadd.f32 %v1606_v34, %v499_v11  ;;  %v570_v16 = vadd.f32 %v1610_v36, %v504_v14  ;;  %v905_v17 = vpack.c.bf16 %v898_v5, %v897_v10  ;;  %992 = vst.msk [vmem:[%s1657_s25 + $0x20] sm:$0xff] %vm585_vm5, %v897_v10 }
 0x3a6   : > { %v1360_v18 = vpop.eup %1359  ;;  %v583_v19 = vpack.c.bf16 %v570_v16, %v567_v15  ;;  %1265 = vmatprep.subr.msk.bf16.mxu0 %vm585_vm5, %v905_v17  ;;  %v920_v20 = vsel %vm585_vm5, %v905_v17, 0 }
 0x3a7   : > { %1256 = vmatpush3.bf16.xpose.msra.mxu0 %v920_v20  ;;  %v509_v21 = vpop.permute.xlu1 %508  ;;  %v899_v22 = vmul.f32 %v1360_v18, %v1634_v41 }
 0x3a8   : > { %586 = vst.msk [vmem:[#allocation3] sm:$0xff] %vm585_vm5, %v583_v19  ;;  %v575_v24 = vadd.f32 %v1604_v33, %v509_v21 }
 0x3a9   : > { %994 = vst.msk [vmem:[%s1657_s25 + $0x30] sm:$0xff] %vm585_vm5, %v899_v22 }
 0x3aa   : > { %v1362_v34 = vpop.eup %1361 }
 0x3ab   : > { %v514_v36 = vpop.permute.xlu1 %513  ;;  %v900_v23 = vmul.f32 %v1362_v34, %v1638_v43 }
 0x3ac   : > { %v578_v25 = vadd.f32 %v1608_v35, %v514_v36 }
 0x3ad   : > { %v906_v26 = vpack.c.bf16 %v900_v23, %v899_v22  ;;  %995 = vst.msk [vmem:[%s1657_s25 + $0x38] sm:$0xff] %vm585_vm5, %v900_v23  ;;  %s1369_s25 = scalar_lea.vmem %s1368_s23, 2048 }
 0x3ae   : > { %v584_v27 = vpack.c.bf16 %v578_v25, %v575_v24  ;;  %p1371_p2 = scmp.lt.s32.totalorder %s1369_s25, %s1363_s8 }
 0x3af   : > { %1266 = vmatprep.subr.msk.bf16.mxu0 %vm585_vm5, %v906_v26  ;;  %v923_v28 = vsel %vm585_vm5, %v906_v26, 0  ;;  %v901_v29 = vld [vmem:[#allocation3] sm:$0xff] }
 0x3b0   : > { %587 = vst.msk [vmem:[#allocation3 + $0x8] sm:$0xff] %vm585_vm5, %v584_v27  ;;  %1258 = vmatpush3.bf16.xpose.msra.mxu0 %v923_v28  ;;  %1259 = vmatprep.mubr.msk.bf16.mxu0 %vm585_vm5, %v901_v29  ;;  %p1372_p3 = por %p1371_p2, %p1370_p1 }
 0x3b2   : > { %p1373_p5 = pnand %p1372_p3, %p1366_p0 }
 0x3b7   : > { %v902_v30 = vld [vmem:[#allocation3 + $0x8] sm:$0xff] }
 0x3b8   : > { %1260 = vmatmul.mubr.msk.bf16.vlgmr.msra.gmra.mrb[4].mxu0 %vm585_vm5, %v902_v30 }
 0x3b9   : > { %1376 = shalt.err (!%p1373_p5)
}
 0x3ba   : > { %s1377_s21 = scalar_lea.hbm %s1698_s13, 1024  ;;  %s1381_s12 = scalar_lea.hbm %s1772_s10, 2048 }
 0x3bb   : > { %p1378_p6 = scmp.ne.s32.totalorder %s1698_s13, %s1377_s21  ;;  %p1382_p10 = scmp.lt.u32.totalorder %s1698_s13, %s1772_s10 }
 0x3bc   : > { %p1383_p11 = scmp.lt.u32.totalorder %s1381_s12, %s1377_s21  ;;  %p1385_p13 = scmp.lt.u32.totalorder %s1377_s21, %s1698_s13 }
 0x3bd   : > { %p1379_p7 = pnand %p1378_p6, %p1547_p4 }
 0x3be   : > { %p1384_p12 = por %p1383_p11, %p1382_p10 }
 0x3bf   : > { %p1380_p9 = pneg %p1379_p7 }
 0x3c0   : > { %p1386_p0 = por %p1385_p13, %p1384_p12 }
 0x3c2   : > { %p1387_p1 = pnand %p1386_p0, %p1380_p9 }
 0x3c4   : > { %1390 = shalt.err (!%p1387_p1)
}
 0x3c5   : > { %s1447_s8 = smov 128   ;;  %s1448_s25 = smov 8  }
 0x3c6   : > { %1267 = dma.vmem_to_hbm [thread:$0]  (%p1547_p4), %s1700_s29, 1024, %s1698_s13, %s1704_s14, %s1447_s8, %s1447_s8, %s1448_s25  }
 0x3c7   : > { %s974_s28 = sld [smem:[#allocation4]]  ;;  %s424_s21 = scalar_lea.vmem %s1771_s9, %s1567_s11 }
 0x3cd   : > { %v975_v33 = vstv %s974_s28 }
 0x48b   : > { %v1261_v35 = vpop.f32.mrb[4].mxu0 }
 0x48c   : > { %v978_v31 = vmul.f32 %v1261_v35, %v975_v33  ;;  %v959_v32 = vpop.f32.mrb[5].mxu0 }
 0x48d   : > { %v976_v37 = vmul.f32 %v975_v33, %v959_v32  ;;  %v1262_v38 = vpop.f32.mrb[6].mxu0 }
 0x48e   : > { %v982_v39 = vadd.f32 %v978_v31, %v1586_v12  ;;  %v979_v40 = vmul.f32 %v1262_v38, %v975_v33  ;;  %v962_v41 = vpop.f32.mrb[7].mxu0 }
 0x48f   : > { %v980_v42 = vadd.f32 %v976_v37, %v1580_v6  ;;  %v977_v43 = vmul.f32 %v975_v33, %v962_v41 }
 0x490   : > { %986 = vst.msk [vmem:[%s424_s21 + $0x10] sm:$0xff] %vm585_vm5, %v982_v39  ;;  %v983_v44 = vadd.f32 %v979_v40, %v1588_v13 }
 0x491   : > { %984 = vst.msk [vmem:[%s424_s21] sm:$0xff] %vm585_vm5, %v980_v42  ;;  %v981_v45 = vadd.f32 %v977_v43, %v1582_v8 }
 0x492   : > { %987 = vst.msk [vmem:[%s424_s21 + $0x18] sm:$0xff] %vm585_vm5, %v983_v44 }
 0x493   : > { %985 = vst.msk [vmem:[%s424_s21 + $0x8] sm:$0xff] %vm585_vm5, %v981_v45 }
 0x494 PF: > { %p1273_p4 = scmp.ge.s32.totalorder %s1441_s20, 2  ;;  %s1049_s24 = sand.u32 1, %s1421_s15  }
 0x495   : > { %s1050_s11 = scalar_lea.sflag [#allocation6], %s1049_s24 }
 0x496   : > { %p1270_p2 = pnand %p1273_p4, %p1554_p8 }
 0x498   : > { %1416 = dma.done.wait (!%p1270_p2), %s1050_s11, 1024  }
 0x499   : > { %1418 = vsyncadd (!%p1270_p2), %s1050_s11, 4294966272  ;;  %s25_s20 = sadd.s32 1, %s1441_s20   ;;  %s1775_s15 = smov %s1425_s16 }
 0x49a   : > { %p22_p3 = scmp.ge.s32.totalorder %s25_s20, 4   ;;  %s1776_s16 = smov %s1429_s17 }
 0x49b   : > { %s1777_s17 = smov %s1560_s27  ;;  %s1778_s18 = smov %s1437_s19 }
 0x49c   : > { %s1779_s19 = smov %s1781_s22  ;;  %24 = sbr.rel (!%p22_p3) target bundleno = 6 (0x6), region = 110 }
 0x4a3   :  { %1055 = vsyncpa [#allocation6], 1 }
 0x4a4   :  { %1057 = vsyncpa [#allocation6 + $0x1], 1 }

</bundles_post_ra>
